<compile_context>
chip_gen: v6e
topology: v6e:2x2x1
jax: 0.10.0
libtpu: 0.0.40
codegen_flags: <defaults>
</compile_context>

<pallas_src>
import functools

import jax
import jax.numpy as jnp
from jax.experimental import pallas as pl
from jax.experimental.pallas import tpu as pltpu


# ----------------------------------------------------------------------------- helpers
def _round_up(x, m):
    return ((x + m - 1) // m) * m


def _pick_row_tile(n_rows, db_bytes_per_row, *, max_tile=2048,
                   budget_bytes=10 * 1024 * 1024):
    """Row tile: as large as a conservative double-buffered VMEM budget allows, but
    capped so the grid has at least 2 steps (lets the "parallel" row axis shard across
    v7x's two TensorCores; ~0.35 us extra step cost elsewhere is negligible)."""
    half = -(-max(n_rows, 1) // 2)            # cdiv(n, 2)
    tile = min(max_tile, _round_up(half, 8))
    while tile > 8 and tile * db_bytes_per_row > budget_bytes:
        tile = max(8, (tile // 2 // 8) * 8)
    return tile


# ----------------------------------------------------------------------------- LayerNorm
def layer_norm_ref(x, gamma, beta, eps=1e-5):
    """XLA-fused LayerNorm (default module path; see perf note at top of file)."""
    x32 = x.astype(jnp.float32)
    mean = jnp.mean(x32, axis=-1, keepdims=True)
    xc = x32 - mean
    var = jnp.mean(xc * xc, axis=-1, keepdims=True)
    out = xc * jax.lax.rsqrt(var + eps) * gamma.astype(jnp.float32) + beta.astype(jnp.float32)
    return out.astype(x.dtype)


def _layer_norm_kernel(x_ref, g_ref, b_ref, o_ref):
    x = x_ref[...].astype(jnp.float32)
    mean = jnp.mean(x, axis=-1, keepdims=True)
    xc = x - mean
    var = jnp.mean(xc * xc, axis=-1, keepdims=True)
    inv = jax.lax.rsqrt(var + 1e-5)
    o_ref[...] = (xc * inv * g_ref[...] + b_ref[...]).astype(o_ref.dtype)


def layer_norm_pallas(x, gamma, beta):
    """Standalone Pallas LayerNorm over the last axis of x: (N, D) -> (N, D).

    Ragged N handled via cdiv grid (no wrapper padding copy); blocks use the full D so
    the (8,128) rule is satisfied by the 'equals full array dim' clause.
    """
    n, d = x.shape
    itemsize = jnp.dtype(x.dtype).itemsize
    tile = _pick_row_tile(n, 2 * 2 * d * itemsize)        # dbl-buffered in + out tile
    grid = (pl.cdiv(n, tile),)
    g2 = gamma.reshape(1, d).astype(jnp.float32)
    b2 = beta.reshape(1, d).astype(jnp.float32)
    return pl.pallas_call(
        _layer_norm_kernel,
        out_shape=jax.ShapeDtypeStruct((n, d), x.dtype),
        grid_spec=pltpu.PrefetchScalarGridSpec(
            num_scalar_prefetch=0,
            grid=grid,
            in_specs=[
                pl.BlockSpec((tile, d), lambda i: (i, 0)),   # s_j row tile (ragged OK)
                pl.BlockSpec((1, d), lambda i: (0, 0)),      # gamma (VMEM-resident)
                pl.BlockSpec((1, d), lambda i: (0, 0)),      # beta  (VMEM-resident)
            ],
            out_specs=pl.BlockSpec((tile, d), lambda i: (i, 0)),
        ),
        compiler_params=pltpu.CompilerParams(dimension_semantics=("parallel",)),
    )(x, g2, b2)


# ----------------------------------------------------------------------------- Dense
def _dense_kernel(x_ref, w_ref, b_ref, o_ref, *, compute_dtype):
    x = x_ref[...]
    if compute_dtype is not None and x.dtype != compute_dtype:
        x = x.astype(compute_dtype)            # cast in VMEM, not in a wrapper HBM pass
    acc = jnp.dot(x, w_ref[...], preferred_element_type=jnp.float32)
    o_ref[...] = (acc + b_ref[...]).astype(o_ref.dtype)    # bias add stays f32


def dense(x, w, b, *, bf16_matmul=False, out_dtype=None):
    """Dense(in_features -> out_features, bias, no activation): x @ w + b.

    No wrapper-side padding / casting / slicing of the activation or output:
      * rows tiled with a cdiv grid (ragged last tile handled by Pallas),
      * K and M blocks use the full array extents (legal; no padded slab, no post-slice),
      * W / bias (tiny, constant index_map) stay VMEM-resident across the grid.
    If K ever grows, mark the W/bias specs pipeline_mode=pl.Buffered(1) (constant
    index_map makes the second buffer pure waste) — a no-op at the current 48 KB W.
    """
    n, k = x.shape
    k_w, m = w.shape
    assert k == k_w, (k, k_w)
    out_dtype = out_dtype or x.dtype

    # Only the tiny resident weight gets a one-time cast; the (E, K) activation is left
    # untouched (pass a bf16 msg end-to-end for the full read-bandwidth saving).
    compute_dtype = jnp.bfloat16 if bf16_matmul else None
    w_op = w.astype(jnp.bfloat16) if bf16_matmul else w
    b_op = b.reshape(1, m).astype(jnp.float32)

    in_bytes = jnp.dtype(x.dtype).itemsize
    out_bytes = jnp.dtype(out_dtype).itemsize
    tile = _pick_row_tile(n, 2 * (k * in_bytes + m * out_bytes))
    grid = (pl.cdiv(n, tile),)

    kernel = functools.partial(_dense_kernel, compute_dtype=compute_dtype)
    return pl.pallas_call(
        kernel,
        out_shape=jax.ShapeDtypeStruct((n, m), out_dtype),
        grid_spec=pltpu.PrefetchScalarGridSpec(
            num_scalar_prefetch=0,
            grid=grid,
            in_specs=[
                pl.BlockSpec((tile, k), lambda i: (i, 0)),   # msg row tile (ragged OK)
                pl.BlockSpec((k, m), lambda i: (0, 0)),      # W  (VMEM-resident)
                pl.BlockSpec((1, m), lambda i: (0, 0)),      # bias (VMEM-resident)
            ],
            out_specs=pl.BlockSpec((tile, m), lambda i: (i, 0)),
        ),
        compiler_params=pltpu.CompilerParams(dimension_semantics=("parallel",)),
    )(x, w_op, b_op)


# ----------------------------------------------------------------------------- module forward
def invariant_transformer_message(s_j, dist, nbrs, msg, params, *, feat_dim,
                                  use_layer_norm=True, bf16_matmul=False,
                                  out_dtype=None):
    """Forward pass of InvariantTransformerMessage.

    `msg` is the output of self.msg_layer (MDMessage) with shape (E, num_heads*feat_dim).
    Returns output.reshape(E, 3, feat_dim), exactly like the PyTorch module.
    """
    # LayerNorm left to XLA fusion (perf review); would feed MDMessage as x_i.
    inp = layer_norm_ref(s_j, params["ln_gamma"], params["ln_beta"]) if use_layer_norm else s_j
    # TODO(synk): MDMessage (rbf / multi-head distance attention over nbrs) is not defined
    # in the provided module source, so it is not translated; `msg` stands in for
    # self.msg_layer(dist=dist, nbrs=nbrs, x_i=inp).
    del dist, nbrs, inp
    out = dense(msg, params["dense_w"], params["dense_b"],
                bf16_matmul=bf16_matmul, out_dtype=out_dtype)
    return out.reshape(out.shape[0], 3, feat_dim)


# ----------------------------------------------------------------------------- self-test
if __name__ == "__main__":
    feat_dim, num_heads = 32, 4
    n_atoms, n_edges = 20, 50            # deliberately not multiples of 8 / tile size

    key = jax.random.PRNGKey(0)
    k = jax.random.split(key, 7)
    s_j = jax.random.normal(k[0], (n_atoms, feat_dim), jnp.float32)
    dist = jax.random.uniform(k[1], (n_edges,), jnp.float32, 0.5, 5.0)
    nbrs = jax.random.randint(k[2], (n_edges, 2), 0, n_atoms)
    # Stand-in for the MDMessage output (see TODO in invariant_transformer_message).
    msg = jax.random.normal(k[3], (n_edges, num_heads * feat_dim), jnp.float32)

    params = {
        "ln_gamma": 1.0 + 0.1 * jax.random.normal(k[4], (feat_dim,), jnp.float32),
        "ln_beta": 0.05 * jax.random.normal(k[5], (feat_dim,), jnp.float32),
        "dense_w": 0.1 * jax.random.normal(
            k[6], (num_heads * feat_dim, 3 * feat_dim), jnp.float32),
        "dense_b": 0.01 * jnp.arange(3 * feat_dim, dtype=jnp.float32),
    }

    # f32 path (full module forward).
    out = invariant_transformer_message(s_j, dist, nbrs, msg, params, feat_dim=feat_dim)
    out = jax.block_until_ready(out)
    assert out.shape == (n_edges, 3, feat_dim), out.shape

    out_ref = (msg @ params["dense_w"] + params["dense_b"]).reshape(n_edges, 3, feat_dim)
    assert jnp.allclose(out, out_ref, atol=5e-5, rtol=1e-5), "dense mismatch"

    # Standalone Pallas LayerNorm kernel vs reference.
    inp_pallas = jax.block_until_ready(
        layer_norm_pallas(s_j, params["ln_gamma"], params["ln_beta"]))
    inp_ref = layer_norm_ref(s_j, params["ln_gamma"], params["ln_beta"])
    assert inp_pallas.shape == (n_atoms, feat_dim), inp_pallas.shape
    assert jnp.allclose(inp_pallas, inp_ref, atol=1e-5, rtol=1e-5), "layer_norm mismatch"

    # bf16 compute path (cast inside the kernel, f32 accumulate, bf16 stores).
    out_bf16 = jax.block_until_ready(
        invariant_transformer_message(s_j, dist, nbrs, msg, params, feat_dim=feat_dim,
                                      bf16_matmul=True, out_dtype=jnp.bfloat16))
    assert out_bf16.dtype == jnp.bfloat16
    assert jnp.allclose(out_bf16.astype(jnp.float32), out_ref,
                        atol=5e-2, rtol=5e-2), "bf16 path mismatch"

    print("KERNEL_OK")
</pallas_src>

<mosaic_0001>
module attributes {stable_mosaic.version = 11 : i64} {
  func.func @_dense_kernel(%arg0: i32, %arg1: memref<32x128xf32, #tpu.memory_space<vmem>>, %arg2: memref<128x96xf32, #tpu.memory_space<vmem>>, %arg3: memref<1x96xf32, #tpu.memory_space<vmem>>, %arg4: memref<32x96xf32, #tpu.memory_space<vmem>>) attributes {dimension_semantics = [#tpu.dimension_semantics<parallel>], iteration_bounds = array<i64: 2>, scalar_prefetch = 0 : i64, scratch_operands = 0 : i64, tpu.core_type = #tpu.core_type<tc>, window_params = [{transform_indices = @transform_0, window_bounds = array<i64: 32, 128>}, {pipeline_mode = #tpu.pipeline_mode<synchronous>, transform_indices = @transform_1, window_bounds = array<i64: 128, 96>}, {pipeline_mode = #tpu.pipeline_mode<synchronous>, transform_indices = @transform_2, window_bounds = array<i64: 1, 96>}, {transform_indices = @transform_3, window_bounds = array<i64: 32, 96>}]} {
    %c0 = arith.constant 0 : index
    %c0_0 = arith.constant 0 : index
    %0 = vector.load %arg1[%c0, %c0_0] : memref<32x128xf32, #tpu.memory_space<vmem>>, vector<32x128xf32>
    %c0_1 = arith.constant 0 : index
    %c0_2 = arith.constant 0 : index
    %1 = vector.load %arg2[%c0_1, %c0_2] : memref<128x96xf32, #tpu.memory_space<vmem>>, vector<128x96xf32>
    %cst = arith.constant dense<0.000000e+00> : vector<32x96xf32>
    %2 = tpu.matmul %0, %1, %cst {dimension_numbers = #tpu.dot_dimension_numbers<[1], [0], [0], [1], [0, 0, 1, 1], [], []>} : vector<32x128xf32>, vector<128x96xf32>, vector<32x96xf32> -> vector<32x96xf32>
    %c0_3 = arith.constant 0 : index
    %c0_4 = arith.constant 0 : index
    %3 = vector.load %arg3[%c0_3, %c0_4] : memref<1x96xf32, #tpu.memory_space<vmem>>, vector<1x96xf32>
    %4 = vector.broadcast %3 : vector<1x96xf32> to vector<32x96xf32>
    %5 = arith.addf %2, %4 : vector<32x96xf32>
    %c0_5 = arith.constant 0 : index
    %c0_6 = arith.constant 0 : index
    %6 = vector.load %arg4[%c0_5, %c0_6] : memref<32x96xf32, #tpu.memory_space<vmem>>, vector<32x96xf32>
    tpu.vector_store %arg4[%c0_5, %c0_6], %5 {strides = array<i32>} : memref<32x96xf32, #tpu.memory_space<vmem>>, vector<32x96xf32>,
    return
  }
  func.func @transform_0(%arg0: i32) -> (i32, i32) {
    %c0_i32 = arith.constant 0 : i32
    %c0_i32_0 = arith.constant 0 : i32
    return %arg0, %c0_i32 : i32, i32
  }
  func.func @transform_1(%arg0: i32) -> (i32, i32) {
    %c0_i32 = arith.constant 0 : i32
    %c0_i32_0 = arith.constant 0 : i32
    %c0_i32_1 = arith.constant 0 : i32
    return %c0_i32, %c0_i32_0 : i32, i32
  }
  func.func @transform_2(%arg0: i32) -> (i32, i32) {
    %c0_i32 = arith.constant 0 : i32
    %c0_i32_0 = arith.constant 0 : i32
    %c0_i32_1 = arith.constant 0 : i32
    return %c0_i32, %c0_i32_0 : i32, i32
  }
  func.func @transform_3(%arg0: i32) -> (i32, i32) {
    %c0_i32 = arith.constant 0 : i32
    %c0_i32_0 = arith.constant 0 : i32
    return %arg0, %c0_i32 : i32, i32
  }
}

</mosaic_0001>

<bundles_post_ra>
// kernel: tpu_custom_call.1
= control target key start
LH: loop header
LB: loop body
LE: loop exit
PB: predicated region body
PF: predicated region fallthrough
CT: control target
= control target key end

     0   :  { %8 = vsyncpa [#allocation3], 0  ;;  %s795_s0 = inlined_call_operand.vmem [shape: f32[50,128], index: 0, kind: input, shape index: {}]   ;;  %s796_s1 = inlined_call_operand.vmem [shape: f32[128,96], index: 1, kind: input, shape index: {}]   ;;  %s797_s2 = inlined_call_operand.vmem [shape: f32[1,96], index: 2, kind: input, shape index: {}]   ;;  %s798_s3 = inlined_call_operand.hbm [shape: f32[50,96], index: 3, kind: output, shape index: {}]  }
   0x1   :  { %10 = vsyncpa [#allocation3 + $0x1], 0  ;;  %s628_s12 = smov 0   ;;  %s630_s13 = smov 0  }
   0x2   :  { %s632_s14 = smov 0   ;;  %s634_s15 = smov 0  }
   0x3 LB: > { %s649_s16 = sadd.s32 4294967295, %s603_s15   ;;  %s395_s17 = sadd.s32 4294967294, %s603_s15   ;;  %s603_s15 = sphi %s634_s15, %s804_s15   ;;  %s599_s14 = sphi %s632_s14, %s803_s14   ;;  %s595_s13 = sphi %s630_s13, %s802_s13   ;;  %s591_s12 = sphi %s628_s12, %s801_s12  }
   0x4   : > { %s653_s18 = sadd.s32 1, %s603_s15   ;;  %s91_s19 = sadd.s32 1, %s599_s14 }
   0x5   : > { %s88_s20 = ssub.s32 %s603_s15, %s653_s18  ;;  %p101_p0 = scmp.ne.s32.totalorder %s599_s14, %s595_s13 }
   0x6   : > { %p89_p1 = scmp.eq.s32.totalorder %s88_s20, 0  ;;  %p102_p2 = scmp.eq.s32.totalorder %s649_s16, 1 }
   0x7   : > { %p107_p3 = scmp.ne.s32.totalorder %s595_s13, %s591_s12  ;;  %p108_p4 = scmp.eq.s32.totalorder %s395_s17, 1 }
   0x8   : > { %s664_s21 = scalar_select %p89_p1, %s599_s14, %s91_s19  }
   0x9   : > { %p666_p5 = por %p102_p2, %p101_p0  ;;  %p670_p6 = por %p108_p4, %p107_p3 }
   0xa   : > { %p398_p7 = scmp.ge.s32.totalorder %s603_s15, 1  ;;  %p149_p8 = scmp.lt.s32.totalorder %s603_s15, 3 }
   0xc   : > { %p150_p9 = pnand %p398_p7, %p149_p8 }
   0xd   : > { %s701_s19 = sshll.u32 (!%p150_p9), %s649_s16, 2  ;;  %s174_s27 = sand.u32 (!%p150_p9), 1, %s595_s13  }
   0xe   : > { %153 = sbr.rel (%p150_p9) target bundleno = 278 (0x116), region = 32  ;;  %p182_p10 = scmp.lt.s32.totalorder (!%p150_p9), %s701_s19, 6 }
   0xf   : > { %s399_s28 = sshll.u32 (!%p150_p9), %s174_s27, 5  ;;  %s736_s5 = scalar_lea.sflag (!%p150_p9), [#allocation3], %s174_s27 }
  0x13   : > { %v215_v0 = vld [vmem:[%s796_s1 + $0x78] sm:$0xff]  ;;  %v214_v1 = vld [vmem:[%s796_s1 + $0x70] sm:$0xff]  ;;  %v213_v2 = vld [vmem:[%s796_s1 + $0x68] sm:$0xff]  ;;  %s183_s4 = scalar_select %p182_p10, %s701_s19, 6  ;;  %vm308_vm0 = vcmask 785408  }
  0x14   : > { %433 = vmatprep.subr.mxu0 %v215_v0  ;;  %471 = vmatprep.subr.mxu1 %v215_v0  ;;  %v212_v3 = vld [vmem:[%s796_s1 + $0x60] sm:$0xff]  ;;  %v211_v4 = vld [vmem:[%s796_s1 + $0x58] sm:$0xff]  ;;  %v210_v5 = vld [vmem:[%s796_s1 + $0x50] sm:$0xff]  ;;  %s322_s6 = ssub.s32 (%p666_p5), 7, %s701_s19 }
  0x15   : > { %434 = vmatpush3.msra.mxu0 %v215_v0  ;;  %487 = vmatpush3.msra.mxu1 %v215_v0  ;;  %v209_v6 = vld [vmem:[%s796_s1 + $0x48] sm:$0xff]  ;;  %v208_v7 = vld [vmem:[%s796_s1 + $0x40] sm:$0xff]  ;;  %v207_v8 = vld [vmem:[%s796_s1 + $0x38] sm:$0xff]  ;;  %s401_s9 = sshll.u32 %s183_s4, 3  ;;  %s176_s4 = scalar_lea.vmem [#allocation2], %s399_s28 }
  0x16   : > { %435 = vmatprep.subr.mxu0 %v214_v1  ;;  %472 = vmatprep.subr.mxu1 %v214_v1  ;;  %v206_v9 = vld [vmem:[%s796_s1 + $0x30] sm:$0xff]  ;;  %v205_v10 = vld [vmem:[%s796_s1 + $0x28] sm:$0xff]  ;;  %v204_v11 = vld [vmem:[%s796_s1 + $0x20] sm:$0xff]  ;;  %s185_s24 = scalar_lea.vmem %s795_s0, %s401_s9  ;;  %p323_p11 = scmp.lt.s32.totalorder (%p666_p5), %s322_s6, 4 }
  0x17   : > { %436 = vmatpush3.msra.mxu0 %v214_v1  ;;  %488 = vmatpush3.msra.mxu1 %v214_v1  ;;  %v203_v12 = vld [vmem:[%s796_s1 + $0x18] sm:$0xff]  ;;  %v202_v13 = vld [vmem:[%s796_s1 + $0x10] sm:$0xff]  ;;  %v201_v14 = vld [vmem:[%s796_s1 + $0x8] sm:$0xff] }
  0x18   : > { %437 = vmatprep.subr.mxu0 %v213_v2  ;;  %473 = vmatprep.subr.mxu1 %v213_v2  ;;  %v200_v15 = vld [vmem:[%s796_s1] sm:$0xff]  ;;  %v198_v17 = vld [vmem:[%s185_s24 + $0x10] sm:$0xff]  ;;  %v197_v18 = vld [vmem:[%s185_s24 + $0x8] sm:$0xff] }
  0x19   : > { %438 = vmatpush3.msra.mxu0 %v213_v2  ;;  %489 = vmatpush3.msra.mxu1 %v213_v2  ;;  %v196_v16 = vld [vmem:[%s185_s24] sm:$0xff]  ;;  %v199_v19 = vld [vmem:[%s185_s24 + $0x18] sm:$0xff] }
  0x1a   : > { %439 = vmatprep.subr.mxu0 %v212_v3  ;;  %474 = vmatprep.subr.mxu1 %v212_v3  ;;  %v402_v20 = vld [vmem:[%s797_s2] ss:$0 sm:$0xff] }
  0x1b   : > { %440 = vmatpush3.msra.mxu0 %v212_v3  ;;  %490 = vmatpush3.msra.mxu1 %v212_v3 }
  0x1c   : > { %441 = vmatprep.subr.mxu0 %v211_v4  ;;  %475 = vmatprep.subr.mxu1 %v211_v4 }
  0x1d   : > { %442 = vmatpush3.msra.mxu0 %v211_v4  ;;  %491 = vmatpush3.msra.mxu1 %v211_v4 }
  0x1e   : > { %443 = vmatprep.subr.mxu0 %v210_v5  ;;  %476 = vmatprep.subr.mxu1 %v210_v5 }
  0x1f   : > { %444 = vmatpush3.msra.mxu0 %v210_v5  ;;  %492 = vmatpush3.msra.mxu1 %v210_v5 }
  0x20   : > { %445 = vmatprep.subr.mxu0 %v209_v6  ;;  %477 = vmatprep.subr.mxu1 %v209_v6 }
  0x21   : > { %446 = vmatpush3.msra.mxu0 %v209_v6  ;;  %493 = vmatpush3.msra.mxu1 %v209_v6 }
  0x22   : > { %447 = vmatprep.subr.mxu0 %v208_v7  ;;  %478 = vmatprep.subr.mxu1 %v208_v7 }
  0x23   : > { %448 = vmatpush3.msra.mxu0 %v208_v7  ;;  %494 = vmatpush3.msra.mxu1 %v208_v7 }
  0x24   : > { %449 = vmatprep.subr.mxu0 %v207_v8  ;;  %479 = vmatprep.subr.mxu1 %v207_v8 }
  0x25   : > { %450 = vmatpush3.msra.mxu0 %v207_v8  ;;  %495 = vmatpush3.msra.mxu1 %v207_v8 }
  0x26   : > { %451 = vmatprep.subr.mxu0 %v206_v9  ;;  %480 = vmatprep.subr.mxu1 %v206_v9 }
  0x27   : > { %452 = vmatpush3.msra.mxu0 %v206_v9  ;;  %496 = vmatpush3.msra.mxu1 %v206_v9 }
  0x28   : > { %453 = vmatprep.subr.mxu0 %v205_v10  ;;  %481 = vmatprep.subr.mxu1 %v205_v10 }
  0x29   : > { %454 = vmatpush3.msra.mxu0 %v205_v10  ;;  %497 = vmatpush3.msra.mxu1 %v205_v10 }
  0x2a   : > { %455 = vmatprep.subr.mxu0 %v204_v11  ;;  %482 = vmatprep.subr.mxu1 %v204_v11 }
  0x2b   : > { %456 = vmatpush3.msra.mxu0 %v204_v11  ;;  %498 = vmatpush3.msra.mxu1 %v204_v11 }
  0x2c   : > { %457 = vmatprep.subr.mxu0 %v203_v12  ;;  %483 = vmatprep.subr.mxu1 %v203_v12 }
  0x2d   : > { %458 = vmatpush3.msra.mxu0 %v203_v12  ;;  %499 = vmatpush3.msra.mxu1 %v203_v12 }
  0x2e   : > { %459 = vmatprep.subr.mxu0 %v202_v13  ;;  %484 = vmatprep.subr.mxu1 %v202_v13 }
  0x2f   : > { %460 = vmatpush3.msra.mxu0 %v202_v13  ;;  %500 = vmatpush3.msra.mxu1 %v202_v13 }
  0x30   : > { %461 = vmatprep.subr.mxu0 %v201_v14  ;;  %485 = vmatprep.subr.mxu1 %v201_v14 }
  0x31   : > { %462 = vmatpush3.msra.mxu0 %v201_v14  ;;  %501 = vmatpush3.msra.mxu1 %v201_v14 }
  0x32   : > { %463 = vmatprep.subr.mxu0 %v200_v15  ;;  %486 = vmatprep.subr.mxu1 %v200_v15 }
  0x33   : > { %464 = vmatpush3.msra.mxu0 %v200_v15  ;;  %502 = vmatpush3.msra.mxu1 %v200_v15 }
  0x34   : > { %465 = vmatprep.mubr.f32.mxu0 %v196_v16  ;;  %468 = vmatprep.mubr.f32.mxu1 %v198_v17 }
  0x35   : > { %466 = vmatmul.mubr.f32.vlgmr.msra.gmra.mxu0 %v197_v18  ;;  %469 = vmatmul.mubr.f32.vlgmr.msra.gmra.mxu1 %v199_v19 }
  0xf5   : > { %v467_v21 = vpop.f32.mrf.mxu0  ;;  %v470_v22 = vpop.f32.mrf.mxu1 }
  0xf6   : > { %v295_v23 = vadd.f32 %v467_v21, %v402_v20  ;;  %v305_v24 = vadd.f32 %v470_v22, %v402_v20  ;;  %320 = sbr.rel (!%p666_p5) target bundleno = 278 (0x116), region = 36 }
  0xf7   : > { %v289_v25 = vpop.f32.mrf.mxu0  ;;  %v299_v26 = vpop.f32.mrf.mxu1 }
  0xf8   : > { %310 = vst.msk [vmem:[%s176_s4 + $0x8] sm:$0xff] %vm308_vm0, %v295_v23  ;;  %312 = vst.msk [vmem:[%s176_s4 + $0x18] sm:$0xff] %vm308_vm0, %v305_v24  ;;  %v290_v27 = vadd.f32 %v402_v20, %v289_v25  ;;  %v300_v28 = vadd.f32 %v402_v20, %v299_v26 }
  0xfa   : > { %309 = vst.msk [vmem:[%s176_s4] sm:$0xff] %vm308_vm0, %v290_v27  ;;  %311 = vst.msk [vmem:[%s176_s4 + $0x10] sm:$0xff] %vm308_vm0, %v300_v28 }
  0xfb   : > { %s806_s6 = smov (!%p323_p11, %s322_s6), 4 }
  0xfc   : > { %s741_s7 = sshll.u32 %s806_s6, 7 }
  0xfd   : > { %s327_s8 = ssub.s32 512, %s741_s7 }
  0xfe   : > { %328 = vsyncadd %s736_s5, %s327_s8  ;;  %p406_p12 = scmp.ne.s32.totalorder %s741_s7, 0  ;;  %s412_s9 = sshll.u32 %s649_s16, 9 }
  0xff   : > { %s750_s22 = scalar_lea.hbm %s798_s3, %s412_s9  ;;  %s333_s17 = sshll.u32 %s176_s4, 4  ;;  %s752_s17 = int_to_ptr.vmem [resolvable:$true] %s333_s17 }
 0x100   : > { %s543_s19 = scalar_lea.vmem %s752_s17, %s741_s7  ;;  %s605_s20 = smov [#allocation2]  }
 0x101   : > { %p544_p13 = scmp.ne.s32.totalorder %s752_s17, %s543_s19  ;;  %s547_s24 = sshll.u32 %s605_s20, 4  ;;  %s548_s24 = int_to_ptr.vmem [resolvable:$false] %s547_s24 }
 0x102   : > { %s549_s16 = scalar_lea.vmem %s548_s24, 1024  ;;  %p550_p2 = scmp.lt.s32.totalorder %s752_s17, %s548_s24 }
 0x103   : > { %p545_p0 = pnand %p544_p13, %p406_p12  ;;  %p551_p3 = scmp.lt.s32.totalorder %s549_s16, %s543_s19 }
 0x105   : > { %p546_p1 = pneg %p545_p0  ;;  %p552_p4 = por %p551_p3, %p550_p2 }
 0x107   : > { %p553_p5 = pnand %p552_p4, %p546_p1 }
 0x109   : > { %556 = shalt.err (!%p553_p5)
}
 0x10a   : > { %s557_s25 = scalar_lea.hbm %s750_s22, %s741_s7  ;;  %s561_s28 = scalar_lea.hbm %s798_s3, 896 }
 0x10b   : > { %p558_p7 = scmp.ne.s32.totalorder %s750_s22, %s557_s25  ;;  %p562_p10 = scmp.lt.s32.totalorder %s750_s22, %s798_s3 }
 0x10c   : > { %p563_p11 = scmp.lt.s32.totalorder %s561_s28, %s557_s25 }
 0x10d   : > { %p559_p8 = pnand %p558_p7, %p406_p12 }
 0x10e   : > { %p564_p13 = por %p563_p11, %p562_p10 }
 0x10f   : > { %p560_p9 = pneg %p559_p8 }
 0x111   : > { %p565_p0 = pnand %p564_p13, %p560_p9 }
 0x113   : > { %568 = shalt.err (!%p565_p0)
}
 0x114   : > { %s606_s4 = smov 128   ;;  %s607_s6 = smov 8  }
 0x115   : > { %339 = dma.vmem_to_hbm [thread:$0]  (%p406_p12), %s752_s17, %s741_s7, %s750_s22, %s736_s5, %s606_s4, %s606_s4, %s607_s6  }
 0x116 PF: > { %p508_p1 = scmp.ge.s32.totalorder %s603_s15, 2  ;;  %s348_s8 = sand.u32 1, %s591_s12  }
 0x117   : > { %s349_s9 = scalar_lea.sflag [#allocation3], %s348_s8 }
 0x118   : > { %p505_p2 = pnand %p508_p1, %p670_p6 }
 0x11a   : > { %p506_p3 = pneg %p505_p2 }
 0x11c   : > { %586 = dma.done.wait (%p506_p3), %s349_s9, 512  }
 0x11d   : > { %588 = vsyncadd (%p506_p3), %s349_s9, 4294966784  ;;  %p13_p4 = scmp.ge.s32.totalorder %s653_s18, 4   ;;  %s801_s12 = smov %s595_s13 }
 0x11e   : > { %s802_s13 = smov %s599_s14  ;;  %s803_s14 = smov %s664_s21 }
 0x11f   : > { %s804_s15 = smov %s653_s18  ;;  %15 = sbr.rel (!%p13_p4) target bundleno = 3 (0x3), region = 67 }
 0x124   :  { %354 = vsyncpa [#allocation3], 1 }
 0x125   :  { %356 = vsyncpa [#allocation3 + $0x1], 1 }

</bundles_post_ra>
